<compile_context>
chip_gen: v6e
topology: v6e:2x2x1
jax: 0.10.0
libtpu: 0.0.40
codegen_flags: <defaults>
</compile_context>

<pallas_src>
import math
import functools

import jax
import jax.numpy as jnp
import numpy as np
from jax.experimental import pallas as pl
from jax.experimental.pallas import tpu as pltpu


def _decoder_kernel(x_ref, w_ref, out_ref, *, hop: int):
    """Fused basis Linear + 50%-hop overlap-and-add for a block of G (batch, speaker) rows.

    x_ref:   (G, N, I)    features x frames (the module's pre-transpose HBM layout)
    w_ref:   (K, N)       basis_lin weight, torch Linear layout, used as-is
    out_ref: (G, I+1, H)  output subframes, H = K // 2 (row-major == time-major)
    """
    H = hop
    w = w_ref[...]                                   # (K, N), tiny, shared across g
    G, _, I = x_ref.shape

    for g in range(G):                               # static unroll over the row batch
        xg = x_ref[g]                                # (N, I) — consumed in HBM layout
        # frames^T = W @ x : canonical MXU matmul (contract over in_chan).  No transpose
        # of the large input operand; f32 accumulation regardless of input dtype.
        ft = jnp.dot(w, xg, preferred_element_type=jnp.float32)     # (K, I)
        f1 = ft[:H, :]                               # (H, I)  first half of every frame
        f2 = ft[H:, :]                               # (H, I)  second half of every frame

        # Overlap-and-add with frame_step = K // 2 (exact 50% overlap), shift-and-add:
        #   y_t[:, 0] = f1[:, 0]
        #   y_t[:, j] = f1[:, j] + f2[:, j-1]   for 1 <= j <= I-1
        #   y_t[:, I] = f2[:, I-1]
        if I > 1:
            mid = f1[:, 1:] + f2[:, :-1]             # (H, I-1) single output-sized temp
            y_t = jnp.concatenate([f1[:, :1], mid, f2[:, -1:]], axis=1)   # (H, I+1)
        else:
            y_t = jnp.concatenate([f1, f2], axis=1)  # (H, 2): single-frame edge case

        # Transpose only the small output tile to subframe-major (I+1, H); the HBM
        # row-major layout of (I+1, H) is exactly the time order, so the wrapper's
        # reshape to (B, C, T) is free.
        out_ref[g] = y_t.T.astype(out_ref.dtype)


def _pick_group_size(bc, n, i, k, in_bytes, out_bytes, w_bytes,
                     budget_bytes=24 * 1024 * 1024):
    """Rows per grid step, sized from the double-buffered *padded* VMEM footprint."""
    h = k // 2
    pad = lambda v, m: -(-v // m) * m
    in_row = pad(n, 8) * pad(i, 128) * in_bytes            # per-g input tile
    out_row = pad(i + 1, 8) * pad(h, 128) * out_bytes      # per-g output tile (lane-padded)
    w_cost = pad(k, 8) * pad(n, 128) * w_bytes
    per_g = 2 * (in_row + out_row)                         # double-buffered in + out
    avail = max(budget_bytes - 2 * w_cost, per_g)
    g = max(1, avail // per_g)
    return int(max(1, min(g, 64, bc)))


def decoder_forward(est_frames, weight, *, kernel_size: int):
    """est_frames: (B, C, in_chan, I); weight: (kernel_size, in_chan) (torch Linear layout).

    Returns est_sigs: (B, C, T) with T = (kernel_size // 2) * (I - 1) + kernel_size.
    """
    B, C, N, I = est_frames.shape
    K = kernel_size
    assert weight.shape == (K, N)
    assert K % 2 == 0, "kernel assumes even kernel_size (exact 50% hop)"
    H = K // 2
    T = H * (I - 1) + K                                    # == H * (I + 1)
    BC = B * C

    out_dtype = est_frames.dtype
    G = _pick_group_size(BC, N, I, K,
                         in_bytes=est_frames.dtype.itemsize,
                         out_bytes=jnp.dtype(out_dtype).itemsize,
                         w_bytes=weight.dtype.itemsize)
    grid = (pl.cdiv(BC, G),)

    x = est_frames.reshape(BC, N, I)                       # contiguous -> free reshape

    out = pl.pallas_call(
        functools.partial(_decoder_kernel, hop=H),
        out_shape=jax.ShapeDtypeStruct((BC, I + 1, H), out_dtype),
        grid_spec=pltpu.PrefetchScalarGridSpec(
            num_scalar_prefetch=0,
            grid=grid,
            in_specs=[
                pl.BlockSpec((G, N, I), lambda g: (g, 0, 0)),   # G rows of features/frames
                pl.BlockSpec((K, N), lambda g: (0, 0)),         # shared basis weight
            ],
            out_specs=pl.BlockSpec((G, I + 1, H), lambda g: (g, 0, 0)),
        ),
        compiler_params=pltpu.CompilerParams(
            dimension_semantics=("parallel",),
            vmem_limit_bytes=48 * 1024 * 1024,
        ),
    )(x, weight)

    return out.reshape(B, C, T)                            # contiguous -> free reshape


def _decoder_reference(est_frames, weight, kernel_size):
    """Pure-JAX reference (Linear + generic overlap-and-add) for validation."""
    B, C, N, I = est_frames.shape
    H = kernel_size // 2
    T = H * (I - 1) + kernel_size
    frames = jnp.einsum("bcni,kn->bcik", est_frames, weight,
                        precision=jax.lax.Precision.HIGHEST)   # (B, C, I, K)
    out = jnp.zeros((B, C, T), frames.dtype)
    for i in range(I):
        out = out.at[:, :, i * H:i * H + kernel_size].add(frames[:, :, i, :])
    return out


if __name__ == "__main__":
    B, C, in_chan, n_frames, kernel_size = 2, 2, 32, 8, 16
    key = jax.random.PRNGKey(0)
    kx, kw = jax.random.split(key)
    est_frames = jax.random.normal(kx, (B, C, in_chan, n_frames), jnp.float32)
    weight = jax.random.normal(kw, (kernel_size, in_chan), jnp.float32) / math.sqrt(in_chan)

    out = decoder_forward(est_frames, weight, kernel_size=kernel_size)
    out = jax.block_until_ready(out)

    T = (kernel_size // 2) * (n_frames - 1) + kernel_size
    assert out.shape == (B, C, T)

    ref = _decoder_reference(est_frames, weight, kernel_size)
    np.testing.assert_allclose(np.asarray(out), np.asarray(ref), rtol=1e-3, atol=1e-3)
    print("KERNEL_OK")
</pallas_src>

<mosaic_0001>
module attributes {stable_mosaic.version = 11 : i64} {
  func.func @_decoder_kernel(%arg0: i32, %arg1: memref<4x32x8xf32, #tpu.memory_space<vmem>>, %arg2: memref<16x32xf32, #tpu.memory_space<vmem>>, %arg3: memref<4x9x8xf32, #tpu.memory_space<vmem>>) attributes {dimension_semantics = [#tpu.dimension_semantics<parallel>], iteration_bounds = array<i64: 1>, scalar_prefetch = 0 : i64, scratch_operands = 0 : i64, tpu.core_type = #tpu.core_type<tc>, window_params = [{transform_indices = @transform_0, window_bounds = array<i64: 4, 32, 8>}, {pipeline_mode = #tpu.pipeline_mode<synchronous>, transform_indices = @transform_1, window_bounds = array<i64: 16, 32>}, {transform_indices = @transform_2, window_bounds = array<i64: 4, 9, 8>}]} {
    %c0 = arith.constant 0 : index
    %c0_0 = arith.constant 0 : index
    %0 = vector.load %arg2[%c0, %c0_0] : memref<16x32xf32, #tpu.memory_space<vmem>>, vector<16x32xf32>
    %c0_1 = arith.constant 0 : index
    %c0_2 = arith.constant 0 : index
    %c0_3 = arith.constant 0 : index
    %1 = vector.load %arg1[%c0_1, %c0_2, %c0_3] : memref<4x32x8xf32, #tpu.memory_space<vmem>>, vector<1x32x8xf32>
    %2 = vector.shape_cast %1 : vector<1x32x8xf32> to vector<32x8xf32>
    %cst = arith.constant dense<0.000000e+00> : vector<16x8xf32>
    %3 = tpu.matmul %0, %2, %cst {dimension_numbers = #tpu.dot_dimension_numbers<[1], [0], [0], [1], [0, 0, 1, 1], [], []>} : vector<16x32xf32>, vector<32x8xf32>, vector<16x8xf32> -> vector<16x8xf32>
    %4 = vector.extract_strided_slice %3 {offsets = [0, 0], sizes = [8, 8], strides = [1, 1]} : vector<16x8xf32> to vector<8x8xf32>
    %5 = vector.extract_strided_slice %3 {offsets = [8, 0], sizes = [8, 8], strides = [1, 1]} : vector<16x8xf32> to vector<8x8xf32>
    %6 = vector.extract_strided_slice %4 {offsets = [0, 1], sizes = [8, 7], strides = [1, 1]} : vector<8x8xf32> to vector<8x7xf32>
    %7 = vector.extract_strided_slice %5 {offsets = [0, 0], sizes = [8, 7], strides = [1, 1]} : vector<8x8xf32> to vector<8x7xf32>
    %8 = arith.addf %6, %7 : vector<8x7xf32>
    %9 = vector.extract_strided_slice %4 {offsets = [0, 0], sizes = [8, 1], strides = [1, 1]} : vector<8x8xf32> to vector<8x1xf32>
    %10 = vector.extract_strided_slice %5 {offsets = [0, 7], sizes = [8, 1], strides = [1, 1]} : vector<8x8xf32> to vector<8x1xf32>
    %11 = tpu.concatenate %9, %8, %10 in 1 : vector<8x1xf32>, vector<8x7xf32>, vector<8x1xf32> -> vector<8x9xf32>
    %12 = tpu.transpose %11, [1, 0] : vector<8x9xf32> -> vector<9x8xf32>
    %c0_4 = arith.constant 0 : index
    %c0_5 = arith.constant 0 : index
    %c0_6 = arith.constant 0 : index
    %13 = vector.load %arg3[%c0_4, %c0_5, %c0_6] : memref<4x9x8xf32, #tpu.memory_space<vmem>>, vector<1x9x8xf32>
    %14 = vector.shape_cast %13 : vector<1x9x8xf32> to vector<9x8xf32>
    %15 = vector.shape_cast %12 : vector<9x8xf32> to vector<1x9x8xf32>
    tpu.vector_store %arg3[%c0_4, %c0_5, %c0_6], %15 {strides = array<i32>} : memref<4x9x8xf32, #tpu.memory_space<vmem>>, vector<1x9x8xf32>,
    %c1 = arith.constant 1 : index
    %c0_7 = arith.constant 0 : index
    %c0_8 = arith.constant 0 : index
    %16 = vector.load %arg1[%c1, %c0_7, %c0_8] : memref<4x32x8xf32, #tpu.memory_space<vmem>>, vector<1x32x8xf32>
    %17 = vector.shape_cast %16 : vector<1x32x8xf32> to vector<32x8xf32>
    %cst_9 = arith.constant dense<0.000000e+00> : vector<16x8xf32>
    %18 = tpu.matmul %0, %17, %cst_9 {dimension_numbers = #tpu.dot_dimension_numbers<[1], [0], [0], [1], [0, 0, 1, 1], [], []>} : vector<16x32xf32>, vector<32x8xf32>, vector<16x8xf32> -> vector<16x8xf32>
    %19 = vector.extract_strided_slice %18 {offsets = [0, 0], sizes = [8, 8], strides = [1, 1]} : vector<16x8xf32> to vector<8x8xf32>
    %20 = vector.extract_strided_slice %18 {offsets = [8, 0], sizes = [8, 8], strides = [1, 1]} : vector<16x8xf32> to vector<8x8xf32>
    %21 = vector.extract_strided_slice %19 {offsets = [0, 1], sizes = [8, 7], strides = [1, 1]} : vector<8x8xf32> to vector<8x7xf32>
    %22 = vector.extract_strided_slice %20 {offsets = [0, 0], sizes = [8, 7], strides = [1, 1]} : vector<8x8xf32> to vector<8x7xf32>
    %23 = arith.addf %21, %22 : vector<8x7xf32>
    %24 = vector.extract_strided_slice %19 {offsets = [0, 0], sizes = [8, 1], strides = [1, 1]} : vector<8x8xf32> to vector<8x1xf32>
    %25 = vector.extract_strided_slice %20 {offsets = [0, 7], sizes = [8, 1], strides = [1, 1]} : vector<8x8xf32> to vector<8x1xf32>
    %26 = tpu.concatenate %24, %23, %25 in 1 : vector<8x1xf32>, vector<8x7xf32>, vector<8x1xf32> -> vector<8x9xf32>
    %27 = tpu.transpose %26, [1, 0] : vector<8x9xf32> -> vector<9x8xf32>
    %c1_10 = arith.constant 1 : index
    %c0_11 = arith.constant 0 : index
    %c0_12 = arith.constant 0 : index
    %28 = vector.load %arg3[%c1_10, %c0_11, %c0_12] : memref<4x9x8xf32, #tpu.memory_space<vmem>>, vector<1x9x8xf32>
    %29 = vector.shape_cast %28 : vector<1x9x8xf32> to vector<9x8xf32>
    %30 = vector.shape_cast %27 : vector<9x8xf32> to vector<1x9x8xf32>
    tpu.vector_store %arg3[%c1_10, %c0_11, %c0_12], %30 {strides = array<i32>} : memref<4x9x8xf32, #tpu.memory_space<vmem>>, vector<1x9x8xf32>,
    %c2 = arith.constant 2 : index
    %c0_13 = arith.constant 0 : index
    %c0_14 = arith.constant 0 : index
    %31 = vector.load %arg1[%c2, %c0_13, %c0_14] : memref<4x32x8xf32, #tpu.memory_space<vmem>>, vector<1x32x8xf32>
    %32 = vector.shape_cast %31 : vector<1x32x8xf32> to vector<32x8xf32>
    %cst_15 = arith.constant dense<0.000000e+00> : vector<16x8xf32>
    %33 = tpu.matmul %0, %32, %cst_15 {dimension_numbers = #tpu.dot_dimension_numbers<[1], [0], [0], [1], [0, 0, 1, 1], [], []>} : vector<16x32xf32>, vector<32x8xf32>, vector<16x8xf32> -> vector<16x8xf32>
    %34 = vector.extract_strided_slice %33 {offsets = [0, 0], sizes = [8, 8], strides = [1, 1]} : vector<16x8xf32> to vector<8x8xf32>
    %35 = vector.extract_strided_slice %33 {offsets = [8, 0], sizes = [8, 8], strides = [1, 1]} : vector<16x8xf32> to vector<8x8xf32>
    %36 = vector.extract_strided_slice %34 {offsets = [0, 1], sizes = [8, 7], strides = [1, 1]} : vector<8x8xf32> to vector<8x7xf32>
    %37 = vector.extract_strided_slice %35 {offsets = [0, 0], sizes = [8, 7], strides = [1, 1]} : vector<8x8xf32> to vector<8x7xf32>
    %38 = arith.addf %36, %37 : vector<8x7xf32>
    %39 = vector.extract_strided_slice %34 {offsets = [0, 0], sizes = [8, 1], strides = [1, 1]} : vector<8x8xf32> to vector<8x1xf32>
    %40 = vector.extract_strided_slice %35 {offsets = [0, 7], sizes = [8, 1], strides = [1, 1]} : vector<8x8xf32> to vector<8x1xf32>
    %41 = tpu.concatenate %39, %38, %40 in 1 : vector<8x1xf32>, vector<8x7xf32>, vector<8x1xf32> -> vector<8x9xf32>
    %42 = tpu.transpose %41, [1, 0] : vector<8x9xf32> -> vector<9x8xf32>
    %c2_16 = arith.constant 2 : index
    %c0_17 = arith.constant 0 : index
    %c0_18 = arith.constant 0 : index
    %43 = vector.load %arg3[%c2_16, %c0_17, %c0_18] : memref<4x9x8xf32, #tpu.memory_space<vmem>>, vector<1x9x8xf32>
    %44 = vector.shape_cast %43 : vector<1x9x8xf32> to vector<9x8xf32>
    %45 = vector.shape_cast %42 : vector<9x8xf32> to vector<1x9x8xf32>
    tpu.vector_store %arg3[%c2_16, %c0_17, %c0_18], %45 {strides = array<i32>} : memref<4x9x8xf32, #tpu.memory_space<vmem>>, vector<1x9x8xf32>,
    %c3 = arith.constant 3 : index
    %c0_19 = arith.constant 0 : index
    %c0_20 = arith.constant 0 : index
    %46 = vector.load %arg1[%c3, %c0_19, %c0_20] : memref<4x32x8xf32, #tpu.memory_space<vmem>>, vector<1x32x8xf32>
    %47 = vector.shape_cast %46 : vector<1x32x8xf32> to vector<32x8xf32>
    %cst_21 = arith.constant dense<0.000000e+00> : vector<16x8xf32>
    %48 = tpu.matmul %0, %47, %cst_21 {dimension_numbers = #tpu.dot_dimension_numbers<[1], [0], [0], [1], [0, 0, 1, 1], [], []>} : vector<16x32xf32>, vector<32x8xf32>, vector<16x8xf32> -> vector<16x8xf32>
    %49 = vector.extract_strided_slice %48 {offsets = [0, 0], sizes = [8, 8], strides = [1, 1]} : vector<16x8xf32> to vector<8x8xf32>
    %50 = vector.extract_strided_slice %48 {offsets = [8, 0], sizes = [8, 8], strides = [1, 1]} : vector<16x8xf32> to vector<8x8xf32>
    %51 = vector.extract_strided_slice %49 {offsets = [0, 1], sizes = [8, 7], strides = [1, 1]} : vector<8x8xf32> to vector<8x7xf32>
    %52 = vector.extract_strided_slice %50 {offsets = [0, 0], sizes = [8, 7], strides = [1, 1]} : vector<8x8xf32> to vector<8x7xf32>
    %53 = arith.addf %51, %52 : vector<8x7xf32>
    %54 = vector.extract_strided_slice %49 {offsets = [0, 0], sizes = [8, 1], strides = [1, 1]} : vector<8x8xf32> to vector<8x1xf32>
    %55 = vector.extract_strided_slice %50 {offsets = [0, 7], sizes = [8, 1], strides = [1, 1]} : vector<8x8xf32> to vector<8x1xf32>
    %56 = tpu.concatenate %54, %53, %55 in 1 : vector<8x1xf32>, vector<8x7xf32>, vector<8x1xf32> -> vector<8x9xf32>
    %57 = tpu.transpose %56, [1, 0] : vector<8x9xf32> -> vector<9x8xf32>
    %c3_22 = arith.constant 3 : index
    %c0_23 = arith.constant 0 : index
    %c0_24 = arith.constant 0 : index
    %58 = vector.load %arg3[%c3_22, %c0_23, %c0_24] : memref<4x9x8xf32, #tpu.memory_space<vmem>>, vector<1x9x8xf32>
    %59 = vector.shape_cast %58 : vector<1x9x8xf32> to vector<9x8xf32>
    %60 = vector.shape_cast %57 : vector<9x8xf32> to vector<1x9x8xf32>
    tpu.vector_store %arg3[%c3_22, %c0_23, %c0_24], %60 {strides = array<i32>} : memref<4x9x8xf32, #tpu.memory_space<vmem>>, vector<1x9x8xf32>,
    return
  }
  func.func @transform_0(%arg0: i32) -> (i32, i32, i32) {
    %c0_i32 = arith.constant 0 : i32
    %c0_i32_0 = arith.constant 0 : i32
    %c0_i32_1 = arith.constant 0 : i32
    return %arg0, %c0_i32, %c0_i32_0 : i32, i32, i32
  }
  func.func @transform_1(%arg0: i32) -> (i32, i32) {
    %c0_i32 = arith.constant 0 : i32
    %c0_i32_0 = arith.constant 0 : i32
    %c0_i32_1 = arith.constant 0 : i32
    return %c0_i32, %c0_i32_0 : i32, i32
  }
  func.func @transform_2(%arg0: i32) -> (i32, i32, i32) {
    %c0_i32 = arith.constant 0 : i32
    %c0_i32_0 = arith.constant 0 : i32
    %c0_i32_1 = arith.constant 0 : i32
    return %arg0, %c0_i32, %c0_i32_0 : i32, i32, i32
  }
}

</mosaic_0001>

<bundles_post_ra>
// kernel: tpu_custom_call.1
= control target key start
LH: loop header
LB: loop body
LE: loop exit
PB: predicated region body
PF: predicated region fallthrough
CT: control target
= control target key end

     0   :  { %vm17_vm0 = vcmask 261120   ;;  %s609_s16 = smov 1   ;;  %vm104_vm1 = vcmask 7168   ;;  %vm106_vm2 = vcmask 64512   ;;  %vm141_vm3 = vcmask 57344   ;;  %s723_s0 = inlined_call_operand.vmem [shape: f32[4,32,8], index: 0, kind: input, shape index: {}]   ;;  %s724_s1 = inlined_call_operand.vmem [shape: f32[16,32], index: 1, kind: input, shape index: {}]   ;;  %s725_s2 = inlined_call_operand.vmem [shape: f32[4,9,8], index: 2, kind: output, shape index: {}]  }
   0x1   :  { %v16_v0 = vld [vmem:[%s723_s0 + $0x18] sm:$0xff]  ;;  %v15_v2 = vld [vmem:[%s723_s0 + $0x10] sm:$0xff]  ;;  %v14_v4 = vld [vmem:[%s723_s0 + $0x8] sm:$0xff] }
   0x2   :  { %v518_v1 = vld [vmem:[%s723_s0 + $0x38] sm:$0xff]  ;;  %563 = vmatprep.subr.mxu0 %v16_v0  ;;  %v517_v3 = vld [vmem:[%s723_s0 + $0x30] sm:$0xff]  ;;  %v516_v5 = vld [vmem:[%s723_s0 + $0x28] sm:$0xff] }
   0x3   :  { %574 = vmatprep.subr.mxu1 %v518_v1  ;;  %564 = vmatpush3.msra.mxu0 %v16_v0  ;;  %v13_v6 = vld [vmem:[%s723_s0] sm:$0xff]  ;;  %v12_v9 = vld [vmem:[%s724_s1 + $0x8] sm:$0xff]  ;;  %v526_v10 = vld [vmem:[%s723_s0 + $0x58] sm:$0xff] }
   0x4   :  { %575 = vmatpush3.msra.mxu1 %v518_v1  ;;  %565 = vmatprep.subr.mxu0 %v15_v2  ;;  %v515_v7 = vld [vmem:[%s723_s0 + $0x20] sm:$0xff]  ;;  %v534_v11 = vld [vmem:[%s723_s0 + $0x78] sm:$0xff]  ;;  %v525_v12 = vld [vmem:[%s723_s0 + $0x50] sm:$0xff] }
   0x5   :  { %576 = vmatprep.subr.mxu1 %v517_v3  ;;  %566 = vmatpush3.msra.mxu0 %v15_v2  ;;  %v11_v8 = vld [vmem:[%s724_s1] sm:$0xff]  ;;  %v533_v13 = vld [vmem:[%s723_s0 + $0x70] sm:$0xff]  ;;  %v524_v14 = vld [vmem:[%s723_s0 + $0x48] sm:$0xff] }
   0x6   :  { %577 = vmatpush3.msra.mxu1 %v517_v3  ;;  %567 = vmatprep.subr.mxu0 %v14_v4  ;;  %v532_v15 = vld [vmem:[%s723_s0 + $0x68] sm:$0xff]  ;;  %v523_v16 = vld [vmem:[%s723_s0 + $0x40] sm:$0xff] }
   0x7   :  { %578 = vmatprep.subr.mxu1 %v516_v5  ;;  %568 = vmatpush3.msra.mxu0 %v14_v4  ;;  %v531_v17 = vld [vmem:[%s723_s0 + $0x60] sm:$0xff] }
   0x8   :  { %579 = vmatpush3.msra.mxu1 %v516_v5  ;;  %569 = vmatprep.subr.mxu0 %v13_v6 }
   0x9   :  { %580 = vmatprep.subr.mxu1 %v515_v7  ;;  %570 = vmatpush3.msra.mxu0 %v13_v6 }
   0xa   :  { %571 = vmatprep.mubr.msk.f32.mxu0 %vm17_vm0, %v11_v8  ;;  %581 = vmatpush3.msra.mxu1 %v515_v7 }
   0xb   :  { %582 = vmatprep.mubr.msk.f32.mxu1 %vm17_vm0, %v11_v8  ;;  %572 = vmatmul.mubr.msk.f32.vlgmr.msra.gmra.mxu0 %vm17_vm0, %v12_v9 }
   0xc   :  { %583 = vmatmul.mubr.msk.f32.vlgmr.msra.gmra.mxu1 %vm17_vm0, %v12_v9  ;;  %585 = vmatprep.subr.mxu0 %v526_v10 }
   0xd   :  { %596 = vmatprep.subr.mxu1 %v534_v11  ;;  %586 = vmatpush3.msra.mxu0 %v526_v10 }
   0xe   :  { %597 = vmatpush3.msra.mxu1 %v534_v11  ;;  %587 = vmatprep.subr.mxu0 %v525_v12 }
   0xf   :  { %598 = vmatprep.subr.mxu1 %v533_v13  ;;  %588 = vmatpush3.msra.mxu0 %v525_v12 }
  0x10   :  { %593 = vmatprep.mubr.msk.f32.mxu0 %vm17_vm0, %v11_v8  ;;  %589 = vmatprep.subr.mxu0 %v524_v14 }
  0x11   :  { %599 = vmatpush3.msra.mxu1 %v533_v13  ;;  %590 = vmatpush3.msra.mxu0 %v524_v14 }
  0x12   :  { %600 = vmatprep.subr.mxu1 %v532_v15  ;;  %591 = vmatprep.subr.mxu0 %v523_v16 }
  0x13   :  { %601 = vmatpush3.msra.mxu1 %v532_v15  ;;  %592 = vmatpush3.msra.mxu0 %v523_v16 }
  0x14   :  { %602 = vmatprep.subr.mxu1 %v531_v17  ;;  %594 = vmatmul.mubr.msk.f32.vlgmr.msra.gmra.mxu0 %vm17_vm0, %v12_v9 }
  0x15   :  { %603 = vmatpush3.msra.mxu1 %v531_v17  ;;  %604 = vmatprep.mubr.msk.f32.mxu1 %vm17_vm0, %v11_v8 }
  0x16   :  { %605 = vmatmul.mubr.msk.f32.vlgmr.msra.gmra.mxu1 %vm17_vm0, %v12_v9 }
  0xcb   :  { %v573_v18 = vpop.f32.mrf.mxu0 }
  0xcc   :  { %v584_v19 = vpop.f32.mrf.mxu1  ;;  %100 = vrot.lane.b32.xlu0 %v573_v18, %s609_s16 }
  0xcd   :  { %224 = vrot.lane.b32.xlu1 %v584_v19, %s609_s16  ;;  %v90_v20 = vpop.f32.mrf.mxu0 }
  0xce   :  { %v214_v21 = vpop.f32.mrf.mxu1 }
  0xd4   :  { %v595_v22 = vpop.f32.mrf.mxu0 }
  0xd5   :  { %346 = vrot.lane.b32.xlu1 %v595_v22, %s609_s16 }
  0xd6   :  { %v606_v23 = vpop.f32.mrf.mxu1  ;;  %v336_v32 = vpop.f32.mrf.mxu0 }
  0xd8   :  { %v458_v36 = vpop.f32.mrf.mxu1 }
  0xd9   :  { %468 = vrot.lane.b32.xlu1 %v606_v23, %s609_s16 }
 0x13e   :  { %v101_v25 = vpop.permute.xlu0 %100 }
 0x13f   :  { %v225_v24 = vpop.permute.xlu1 %224  ;;  %v103_v27 = vadd.f32 %v101_v25, %v90_v20 }
 0x140   :  { %v227_v26 = vadd.f32 %v225_v24, %v214_v21 }
 0x141   :  { %v105_v29 = vsel %vm104_vm1, %v90_v20, %v103_v27 }
 0x142   :  { %v228_v28 = vsel %vm104_vm1, %v214_v21, %v227_v26  ;;  %v107_v31 = vsel %vm106_vm2, %v105_v29, %v101_v25 }
 0x143   :  { %v229_v30 = vsel %vm106_vm2, %v228_v28, %v225_v24  ;;  %108 = vxpose.xlu0.b32.start.end [1/1] (short) (narrow) %v107_v31, 16 }
 0x144   :  { %230 = vxpose.xlu1.b32.start.end [1/1] (short) (narrow) %v229_v30, 16 }
 0x147   :  { %v347_v33 = vpop.permute.xlu1 %346 }
 0x148   :  { %v349_v34 = vadd.f32 %v347_v33, %v336_v32 }
 0x14a   :  { %v350_v35 = vsel %vm104_vm1, %v336_v32, %v349_v34 }
 0x14b   :  { %v469_v37 = vpop.permute.xlu1 %468  ;;  %v351_v38 = vsel %vm106_vm2, %v350_v35, %v347_v33 }
 0x14c   :  { %v471_v39 = vadd.f32 %v469_v37, %v458_v36  ;;  %352 = vxpose.xlu0.b32.start.end [1/1] (short) (narrow) %v351_v38, 16 }
 0x14e   :  { %v472_v40 = vsel %vm104_vm1, %v458_v36, %v471_v39 }
 0x14f   :  { %v473_v41 = vsel %vm106_vm2, %v472_v40, %v469_v37 }
 0x151   :  { %474 = vxpose.xlu0.b32.start.end [1/1] (short) (narrow) %v473_v41, 16 }
 0x1bf   :  { %v124_v42 = vpop.trf.xlu0 }
 0x1c0   :  { %v246_v43 = vpop.trf.xlu1  ;;  %140 = vst.msk [vmem:[%s725_s2] sm:$0xff] %vm106_vm2, %v124_v42 }
 0x1c1   :  { %521 = vst.msk [vmem:[%s725_s2 + $0x10] sm:$0xff] %vm106_vm2, %v246_v43 }
 0x1c3   :  { %v125_v44 = vpop.trf.xlu0 }
 0x1c4   :  { %v247_v45 = vpop.trf.xlu1  ;;  %142 = vst.msk [vmem:[%s725_s2 + $0x8] sm:$0x1] %vm141_vm3, %v125_v44 }
 0x1c5   :  { %522 = vst.msk [vmem:[%s725_s2 + $0x18] sm:$0x1] %vm141_vm3, %v247_v45 }
 0x1c8   :  { %v368_v46 = vpop.trf.xlu0 }
 0x1c9   :  { %529 = vst.msk [vmem:[%s725_s2 + $0x20] sm:$0xff] %vm106_vm2, %v368_v46 }
 0x1cc   :  { %v369_v47 = vpop.trf.xlu0 }
 0x1cd   :  { %530 = vst.msk [vmem:[%s725_s2 + $0x28] sm:$0x1] %vm141_vm3, %v369_v47 }
 0x1d0   :  { %v490_v48 = vpop.trf.xlu0 }
 0x1d1   :  { %537 = vst.msk [vmem:[%s725_s2 + $0x30] sm:$0xff] %vm106_vm2, %v490_v48 }
 0x1d4   :  { %v491_v49 = vpop.trf.xlu0 }
 0x1d5   :  { %538 = vst.msk [vmem:[%s725_s2 + $0x38] sm:$0x1] %vm141_vm3, %v491_v49 }

</bundles_post_ra>
